<compile_context>
chip_gen: v7x
topology: tpu7x:2x2x1
jax: 0.10.0
libtpu: 0.0.40
codegen_flags: <defaults>
</compile_context>

<pallas_src>
import jax
import jax.numpy as jnp
from jax.experimental import pallas as pl
from jax.experimental.pallas import tpu as pltpu


# ----------------------------------------------------------------------------
# Buffer bookkeeping (get_buffer_length in the reference code)
# ----------------------------------------------------------------------------
BUFFER_LENGTHS = {
    'beauty': 3, 'mirror': 3, 'mirror_hit': 3, 'mirror_normal': 3,
    'roughness': 1, 'indirect': 3, 'normal': 3, 'depth': 1,
}


def get_buffer_length(name):
    return BUFFER_LENGTHS[name]


# ----------------------------------------------------------------------------
# Fused per-generator Pallas kernel: 1x1-conv (matmul) + bias map + MSE partial
# ----------------------------------------------------------------------------
def _gen_fused_kernel(x_ref, w_ref, bias_ref, tgt_ref, y_ref, loss_ref):
    # x_ref:    (K, TN)     bf16 spatial channels, batch folded into pixel axis
    # w_ref:    (cout, K)   bf16 spatial 1x1-conv weights (transposed)
    # bias_ref: (cout, TN)  f32 per-pixel bias map (constant channels folded)
    # tgt_ref:  (cout, TN)  bf16 target pixels
    # y_ref:    (cout, TN)  f32 lane-dense output (TN multiple of 128)
    # loss_ref: (1, TN)     f32 lane-dense per-tile partial squared error
    #
    # NOTE: with cout<=3, K<=10 the MXU is mostly padding; kept as jnp.dot
    # since the kernel is launch/DMA-bound, not MXU-bound (perf review).
    y = jnp.dot(w_ref[...], x_ref[...], preferred_element_type=jnp.float32)
    y = y + bias_ref[...]                     # f32 epilogue (v5e-safe VPU path)
    y_ref[...] = y
    d = y - tgt_ref[...].astype(jnp.float32)
    # Sublane-only reduction -> lane-dense partial; final sum is done in jnp.
    loss_ref[...] = jnp.sum(d * d, axis=0, keepdims=True)


def _pick_pixel_tile(total_pixels):
    """Largest lane-dense (multiple-of-128) divisor of total_pixels, capped at
    16384, that still leaves >=2 grid steps (v7x megacore). Per-step VMEM is
    tiny (<1 MiB double-buffered), so only grid-step overhead matters."""
    if total_pixels % 128 != 0 or total_pixels < 256:
        # TODO(synk): non-128-multiple pixel counts fall back to a single
        # full-extent block (masked partial stores) -- expected at tiny sizes.
        return total_pixels
    cap = min(16384, total_pixels // 2)       # keep >=2 parallel grid steps
    best = 128
    for cand in range(128, cap + 1, 128):
        if total_pixels % cand == 0:
            best = cand
    return best


def fused_generator(x_sp, w_sp_t, bias_map, target):
    """Batch-collapsed 1x1-conv + bias with fused lane-dense MSE partials.

    x_sp:     (K, P)     bf16 channel-major spatial features, P = B*HW
    w_sp_t:   (cout, K)  bf16 spatial weights (transposed, lane-dense output)
    bias_map: (cout, P)  f32 per-pixel bias (constant channels folded in jnp)
    target:   (cout, P)  bf16 targets
    Returns y (cout, P) f32 and loss_partials (n_tiles, 1, TN) f32.
    """
    k, p = x_sp.shape
    cout = w_sp_t.shape[0]
    tn = _pick_pixel_tile(p)
    n_tiles = p // tn

    def stream_spec(shape, index_map):
        # Deeper pipelining only pays off once there are enough grid steps.
        if n_tiles >= 4:
            return pl.BlockSpec(shape, index_map, pipeline_mode=pl.Buffered(3))
        return pl.BlockSpec(shape, index_map)

    bytes_accessed = ((k * p + cout * k) * 2      # bf16 x, w
                      + cout * p * 4              # f32 bias map
                      + cout * p * 2              # bf16 target
                      + cout * p * 4              # f32 y
                      + n_tiles * tn * 4)         # f32 loss partials
    cost = pl.CostEstimate(flops=2 * cout * k * p, transcendentals=0,
                           bytes_accessed=bytes_accessed)

    return pl.pallas_call(
        _gen_fused_kernel,
        grid=(n_tiles,),
        in_specs=[
            stream_spec((k, tn), lambda ti: (0, ti)),
            pl.BlockSpec((cout, k), lambda ti: (0, 0)),
            pl.BlockSpec((cout, tn), lambda ti: (0, ti)),
            stream_spec((cout, tn), lambda ti: (0, ti)),
        ],
        out_specs=(
            pl.BlockSpec((cout, tn), lambda ti: (0, ti)),
            pl.BlockSpec((None, 1, tn), lambda ti: (ti, 0, 0)),
        ),
        out_shape=(
            jax.ShapeDtypeStruct((cout, p), jnp.float32),
            jax.ShapeDtypeStruct((n_tiles, 1, tn), jnp.float32),
        ),
        compiler_params=pltpu.CompilerParams(
            dimension_semantics=("parallel",)),
        cost_estimate=cost,
    )(x_sp, w_sp_t, bias_map, target)


# ----------------------------------------------------------------------------
# Tiny elementwise pre-processing in plain jnp (fused by XLA under jit).
# ----------------------------------------------------------------------------
def clamp_pass(x):
    return jnp.clip(x, 0.0, 1e25)


def mask_zero(x, roughness):
    return jnp.where(roughness > 0.75, jnp.zeros_like(x), x)


# ----------------------------------------------------------------------------
# Glue: nearest-neighbor resize (F.interpolate default mode='nearest')
# ----------------------------------------------------------------------------
def nearest_resize(x, size):
    h, w = x.shape[-2], x.shape[-1]
    if h == size and w == size:
        return x
    hi = jnp.floor(jnp.arange(size) * (h / size)).astype(jnp.int32)
    wi = jnp.floor(jnp.arange(size) * (w / size)).astype(jnp.int32)
    x = jnp.take(x, hi, axis=-2)
    x = jnp.take(x, wi, axis=-1)
    return x


# ----------------------------------------------------------------------------
# create_*_tensor helpers (JAX ports of the reference functions)
# ----------------------------------------------------------------------------
def create_query_tensor(pass_dict, passes, size):
    if passes != []:
        tensors = []
        for key in passes:
            if key == 'indirect':
                pass_dict[key] = clamp_pass(pass_dict[key])
            if key in ('mirror_hit', 'mirror', 'mirror_normal'):
                if 'roughness' in passes:
                    pass_dict[key] = jax.lax.stop_gradient(
                        mask_zero(pass_dict[key], pass_dict['roughness']))
            tensors.append(pass_dict[key])
        tensor = jnp.concatenate(tensors, axis=1)
        return nearest_resize(tensor, size)
    else:
        element = next(iter(pass_dict.values()))
        return jnp.zeros((element.shape[1], 0, size, size), dtype=element.dtype)


def create_observation_tensor(pass_dict, passes, size):
    if passes != []:
        tensors = []
        for key in passes:
            if key == 'indirect':
                pass_dict[key] = clamp_pass(pass_dict[key])
            if key in ('mirror_hit', 'mirror', 'mirror_normal'):
                if 'roughness' in passes:
                    pass_dict[key] = jax.lax.stop_gradient(
                        mask_zero(pass_dict[key], pass_dict['roughness']))
            tensors.append(pass_dict[key])
        tensor = jnp.concatenate(tensors, axis=2)
        b, n, c, h, w = tensor.shape
        tensor = tensor.reshape(b * n, c, h, w)
        tensor = nearest_resize(tensor, size)
        return tensor.reshape(b, n, c, size, size)
    else:
        element = next(iter(pass_dict.values()))
        return jnp.zeros((element.shape[1], element.shape[2], 0, size, size),
                         dtype=element.dtype)


def create_representation(repr_list, representations):
    if len(repr_list) == 0:
        return jnp.zeros((representations[0].shape[0], 0, 1, 1),
                         dtype=representations[0].dtype)
    r = representations[repr_list[0]]
    for j in range(1, len(repr_list)):
        r2 = representations[repr_list[j]]
        # TODO(synk): the reference's cross-size representation resize branch is
        # buggy (references an undefined `tensor`); only same-size concat here.
        r = jnp.concatenate([r, r2], axis=1)
    return r


# ----------------------------------------------------------------------------
# GeneratorHandler (forward pass)
# ----------------------------------------------------------------------------
class GeneratorHandlerPallas:
    def __init__(self, settings):
        gens = settings['generators']
        self.num_generators = len(gens)
        self.sizes = [g['render_size'] for g in gens]
        self.input_passes = [g['query_passes'] for g in gens]
        self.output_passes = [g['output_passes'] for g in gens]
        self.repr_lists = [g['representations'] for g in gens]
        self.override_sample = [g['override_sample'] for g in gens]
        self.override_train = [g['override_train'] for g in gens]
        self.detach = [g['detach'] for g in gens]
        self.loss_discard = [g['discard_loss'] for g in gens]
        self.observation_passes = []
        for rep in settings['representations']:
            self.observation_passes += rep['observation_passes']

        # TODO(synk): real GQNGenerator/UnetGenerator/PixelCNN/SumNet modules are
        # external and not provided; replaced with a deterministic 1x1-conv
        # (per-pixel linear) generator consuming the same inputs + MSE loss.
        pose_dim = settings['pose_dim']
        obs_ch = sum(get_buffer_length(p) for p in self.observation_passes)
        self.params = []
        pkey = jax.random.PRNGKey(1)
        for i in range(self.num_generators):
            cin = sum(get_buffer_length(p) for p in self.input_passes[i])
            r_ch = sum(settings['repr_channels'][j] for j in self.repr_lists[i])
            k_total = cin + r_ch + pose_dim + obs_ch + pose_dim
            cout = sum(get_buffer_length(p) for p in self.output_passes[i])
            pkey, wk, bk = jax.random.split(pkey, 3)
            w_full = (jax.random.normal(wk, (k_total, cout), jnp.float32)
                      / jnp.sqrt(k_total))
            b_lin = 0.01 * jax.random.normal(bk, (cout,), jnp.float32)
            # Spatial rows feed the Pallas matmul (transposed + bf16 for a
            # lane-dense pixel-axis output on the native-bf16 MXU); constant
            # rows are folded into a per-image bias (1x1-conv identity).
            w_sp_t = jnp.transpose(w_full[:cin]).astype(jnp.bfloat16)  # (cout,cin)
            w_const = w_full[cin:]                                     # (k_const,cout)
            self.params.append((w_sp_t, w_const, b_lin))

        # Whole-step jit: removes per-op Python/XLA dispatch which dominates
        # wall clock at these KFLOP-scale shapes (perf review, item #1).
        self.forward = jax.jit(self._forward)

    # --- synthetic per-generator forward (fused Pallas kernel) --------------
    def _generator(self, i, input_tensor, output_tensor, observation_tensor,
                   query_poses, observation_poses, r, iteration):
        del iteration
        b, cin, h, w = input_tensor.shape
        hw = h * w
        p = b * hw
        w_sp_t, w_const, b_lin = self.params[i]
        cout = w_sp_t.shape[0]

        # Spatially-constant channels -> tiny per-image bias in jnp (B x ~26 x
        # cout matmul): avoids materializing HxW broadcasts in HBM.
        # TODO(synk): observation context is mean-pooled per image, which is
        # only exactly the 1x1-conv identity for spatially-constant context.
        consts = [r[:, :, 0, 0], query_poses]
        if observation_tensor.shape[2] > 0:
            consts.append(observation_tensor.mean(axis=(1, 3, 4)))   # (B, C_obs)
        else:
            consts.append(jnp.zeros((b, 0), jnp.float32))
        consts.append(observation_poses.mean(axis=1))                # (B, P)
        const_x = jnp.concatenate(consts, axis=1)                    # (B, K_const)
        bias = const_x @ w_const + b_lin                             # (B, cout)

        # Channel-major with batch folded into the pixel (lane) axis.
        tgt = jnp.transpose(output_tensor.reshape(b, cout, hw),
                            (1, 0, 2)).reshape(cout, p)
        if cin > 0:
            x_sp = jnp.transpose(input_tensor.reshape(b, cin, hw),
                                 (1, 0, 2)).reshape(cin, p)
            bias_map = jnp.repeat(bias.T, hw, axis=1)                # (cout, B*HW)
            y, loss_part = fused_generator(x_sp.astype(jnp.bfloat16),
                                           w_sp_t,
                                           bias_map,
                                           tgt.astype(jnp.bfloat16))
            sq_err = jnp.sum(loss_part)
            generated = jnp.transpose(y.reshape(cout, b, hw),
                                      (1, 0, 2)).reshape(b, cout, h, w)
        else:
            # TODO(synk): degenerate no-spatial-input generator falls back to jnp.
            y = jnp.broadcast_to(bias[:, :, None], (b, cout, hw))
            sq_err = jnp.sum((y - output_tensor.reshape(b, cout, hw)) ** 2)
            generated = y.reshape(b, cout, h, w)

        mse = sq_err / (b * cout * hw)
        # TODO(synk): forward-only port; no custom_vjp is defined for the fused
        # Pallas kernel, so differentiating the loss would need a jnp fallback.
        return {'generated': generated, 'losses': {'mse_%d' % i: mse}}

    def separate_output(self, output, index):
        buffers = {}
        offset = 0
        for buf in self.output_passes[index]:
            buf_len = get_buffer_length(buf)
            buffers[buf] = output[:, offset:offset + buf_len]
            offset += buf_len
        return buffers

    def _forward(self, observation_passes, observation_poses, query_passes,
                 query_poses, representations, iteration):
        loss = jnp.float32(0.0)
        outputs = []
        metrics = {}
        query_pass_state = {k: v for k, v in query_passes.items()}
        for i in range(self.num_generators):
            input_tensor = create_query_tensor(
                query_pass_state, self.input_passes[i], self.sizes[i])
            output_tensor = create_query_tensor(
                query_passes, self.output_passes[i], self.sizes[i])
            observation_tensor = create_observation_tensor(
                observation_passes, self.observation_passes, self.sizes[i])
            r = create_representation(self.repr_lists[i], representations)
            output = self._generator(i, input_tensor, output_tensor,
                                     observation_tensor, query_poses,
                                     observation_poses, r, iteration)
            for key in output['losses']:
                value = jnp.mean(output['losses'][key])
                if not self.loss_discard[i]:
                    loss = loss + value
                # Keep device scalars: no float() -> no per-generator
                # device->host sync; convert on the host after the step.
                metrics[key] = value
            output_buffers = self.separate_output(output['generated'], i)
            outputs.append(dict(output_buffers))
            if self.override_train[i]:
                for key in output_buffers:
                    if self.detach[i]:
                        output_buffers[key] = jax.lax.stop_gradient(
                            output_buffers[key])
                    query_pass_state[key] = output_buffers[key]
        return outputs, loss, metrics


# ----------------------------------------------------------------------------
# main
# ----------------------------------------------------------------------------
if __name__ == "__main__":
    settings = {
        'pose_dim': 7,
        'repr_channels': [8],
        'representations': [{'observation_passes': ['beauty', 'roughness']}],
        'generators': [
            {'type': 'GQN', 'render_size': 16,
             'query_passes': ['beauty', 'roughness', 'mirror', 'indirect'],
             'output_passes': ['mirror'], 'representations': [0],
             'override_sample': True, 'override_train': True,
             'discard_loss': False, 'detach': True},
            {'type': 'GQN', 'render_size': 16,
             'query_passes': ['beauty', 'mirror'],
             'output_passes': ['beauty'], 'representations': [0],
             'override_sample': False, 'override_train': False,
             'discard_loss': False, 'detach': False},
        ],
    }

    key = jax.random.PRNGKey(0)
    ks = jax.random.split(key, 9)
    B, N_OBS, H, W, OBS_HW, POSE = 2, 3, 16, 16, 32, 7

    query_passes = {
        'beauty':    jax.random.uniform(ks[0], (B, 3, H, W), jnp.float32),
        'roughness': jax.random.uniform(ks[1], (B, 1, H, W), jnp.float32),
        'mirror':    jax.random.uniform(ks[2], (B, 3, H, W), jnp.float32),
        'indirect':  jax.random.uniform(ks[3], (B, 3, H, W), jnp.float32,
                                        minval=-1.0, maxval=2.0),
    }
    observation_passes = {
        'beauty':    jax.random.uniform(ks[4], (B, N_OBS, 3, OBS_HW, OBS_HW),
                                        jnp.float32),
        'roughness': jax.random.uniform(ks[5], (B, N_OBS, 1, OBS_HW, OBS_HW),
                                        jnp.float32),
    }
    query_poses = jax.random.normal(ks[6], (B, POSE), jnp.float32)
    observation_poses = jax.random.normal(ks[7], (B, N_OBS, POSE), jnp.float32)
    representations = [jax.random.normal(ks[8], (B, 8, 1, 1), jnp.float32)]

    handler = GeneratorHandlerPallas(settings)
    outputs, loss, metrics = handler.forward(
        observation_passes, observation_poses, query_passes, query_poses,
        representations, iteration=0)

    jax.block_until_ready(loss)
    for buffers in outputs:
        for v in buffers.values():
            jax.block_until_ready(v)
    # Host-side metric conversion only after the whole step completed.
    host_metrics = {k: float(v) for k, v in metrics.items()}
    del host_metrics
    print("KERNEL_OK")
</pallas_src>

<mosaic_0001>
module attributes {stable_mosaic.version = 11 : i64} {
  func.func @_gen_fused_kernel(%arg0: i32, %arg1: memref<10x256xbf16, #tpu.memory_space<vmem>>, %arg2: memref<3x10xbf16, #tpu.memory_space<vmem>>, %arg3: memref<3x256xf32, #tpu.memory_space<vmem>>, %arg4: memref<3x256xbf16, #tpu.memory_space<vmem>>, %arg5: memref<3x256xf32, #tpu.memory_space<vmem>>, %arg6: memref<1x1x256xf32, #tpu.memory_space<vmem>>) attributes {dimension_semantics = [#tpu.dimension_semantics<parallel>], iteration_bounds = array<i64: 2>, scalar_prefetch = 0 : i64, scratch_operands = 0 : i64, tpu.core_type = #tpu.core_type<tc>, window_params = [{transform_indices = @transform_0, window_bounds = array<i64: 10, 256>}, {pipeline_mode = #tpu.pipeline_mode<synchronous>, transform_indices = @transform_1, window_bounds = array<i64: 3, 10>}, {transform_indices = @transform_2, window_bounds = array<i64: 3, 256>}, {transform_indices = @transform_3, window_bounds = array<i64: 3, 256>}, {transform_indices = @transform_4, window_bounds = array<i64: 3, 256>}, {transform_indices = @transform_5, window_bounds = array<i64: 1, 1, 256>}]} {
    %c0 = arith.constant 0 : index
    %c0_0 = arith.constant 0 : index
    %0 = vector.load %arg2[%c0, %c0_0] : memref<3x10xbf16, #tpu.memory_space<vmem>>, vector<3x10xbf16>
    %c0_1 = arith.constant 0 : index
    %c0_2 = arith.constant 0 : index
    %1 = vector.load %arg1[%c0_1, %c0_2] : memref<10x256xbf16, #tpu.memory_space<vmem>>, vector<10x256xbf16>
    %cst = arith.constant dense<0.000000e+00> : vector<3x256xf32>
    %2 = tpu.matmul %0, %1, %cst {dimension_numbers = #tpu.dot_dimension_numbers<[1], [0], [0], [1], [0, 0, 1, 1], [], []>} : vector<3x10xbf16>, vector<10x256xbf16>, vector<3x256xf32> -> vector<3x256xf32>
    %c0_3 = arith.constant 0 : index
    %c0_4 = arith.constant 0 : index
    %3 = vector.load %arg3[%c0_3, %c0_4] : memref<3x256xf32, #tpu.memory_space<vmem>>, vector<3x256xf32>
    %4 = arith.addf %2, %3 : vector<3x256xf32>
    %c0_5 = arith.constant 0 : index
    %c0_6 = arith.constant 0 : index
    %5 = vector.load %arg5[%c0_5, %c0_6] : memref<3x256xf32, #tpu.memory_space<vmem>>, vector<3x256xf32>
    tpu.vector_store %arg5[%c0_5, %c0_6], %4 {strides = array<i32>} : memref<3x256xf32, #tpu.memory_space<vmem>>, vector<3x256xf32>,
    %c0_7 = arith.constant 0 : index
    %c0_8 = arith.constant 0 : index
    %6 = vector.load %arg4[%c0_7, %c0_8] : memref<3x256xbf16, #tpu.memory_space<vmem>>, vector<3x256xbf16>
    %7 = arith.extf %6 : vector<3x256xbf16> to vector<3x256xf32>
    %8 = arith.subf %4, %7 : vector<3x256xf32>
    %9 = arith.mulf %8, %8 : vector<3x256xf32>
    %cst_9 = arith.constant dense<0.000000e+00> : vector<256xf32>
    %10 = vector.multi_reduction <add>, %9, %cst_9 [0] : vector<3x256xf32> to vector<256xf32>
    %11 = vector.shape_cast %10 : vector<256xf32> to vector<1x256xf32>
    %c0_10 = arith.constant 0 : index
    %c0_11 = arith.constant 0 : index
    %c0_12 = arith.constant 0 : index
    %12 = vector.load %arg6[%c0_10, %c0_11, %c0_12] : memref<1x1x256xf32, #tpu.memory_space<vmem>>, vector<1x1x256xf32>
    %13 = vector.shape_cast %12 : vector<1x1x256xf32> to vector<1x256xf32>
    %14 = vector.shape_cast %11 : vector<1x256xf32> to vector<1x1x256xf32>
    tpu.vector_store %arg6[%c0_10, %c0_11, %c0_12], %14 {strides = array<i32>} : memref<1x1x256xf32, #tpu.memory_space<vmem>>, vector<1x1x256xf32>,
    return
  }
  func.func @transform_0(%arg0: i32) -> (i32, i32) {
    %c0_i32 = arith.constant 0 : i32
    %c0_i32_0 = arith.constant 0 : i32
    return %c0_i32, %arg0 : i32, i32
  }
  func.func @transform_1(%arg0: i32) -> (i32, i32) {
    %c0_i32 = arith.constant 0 : i32
    %c0_i32_0 = arith.constant 0 : i32
    %c0_i32_1 = arith.constant 0 : i32
    return %c0_i32, %c0_i32_0 : i32, i32
  }
  func.func @transform_2(%arg0: i32) -> (i32, i32) {
    %c0_i32 = arith.constant 0 : i32
    %c0_i32_0 = arith.constant 0 : i32
    return %c0_i32, %arg0 : i32, i32
  }
  func.func @transform_3(%arg0: i32) -> (i32, i32) {
    %c0_i32 = arith.constant 0 : i32
    %c0_i32_0 = arith.constant 0 : i32
    return %c0_i32, %arg0 : i32, i32
  }
  func.func @transform_4(%arg0: i32) -> (i32, i32) {
    %c0_i32 = arith.constant 0 : i32
    %c0_i32_0 = arith.constant 0 : i32
    return %c0_i32, %arg0 : i32, i32
  }
  func.func @transform_5(%arg0: i32) -> (i32, i32, i32) {
    %c0_i32 = arith.constant 0 : i32
    %c0_i32_0 = arith.constant 0 : i32
    %c0_i32_1 = arith.constant 0 : i32
    return %arg0, %c0_i32, %c0_i32_0 : i32, i32, i32
  }
}

module attributes {stable_mosaic.version = 11 : i64} {
  func.func @_gen_fused_kernel(%arg0: i32, %arg1: memref<6x256xbf16, #tpu.memory_space<vmem>>, %arg2: memref<3x6xbf16, #tpu.memory_space<vmem>>, %arg3: memref<3x256xf32, #tpu.memory_space<vmem>>, %arg4: memref<3x256xbf16, #tpu.memory_space<vmem>>, %arg5: memref<3x256xf32, #tpu.memory_space<vmem>>, %arg6: memref<1x1x256xf32, #tpu.memory_space<vmem>>) attributes {dimension_semantics = [#tpu.dimension_semantics<parallel>], iteration_bounds = array<i64: 2>, scalar_prefetch = 0 : i64, scratch_operands = 0 : i64, tpu.core_type = #tpu.core_type<tc>, window_params = [{transform_indices = @transform_0, window_bounds = array<i64: 6, 256>}, {pipeline_mode = #tpu.pipeline_mode<synchronous>, transform_indices = @transform_1, window_bounds = array<i64: 3, 6>}, {transform_indices = @transform_2, window_bounds = array<i64: 3, 256>}, {transform_indices = @transform_3, window_bounds = array<i64: 3, 256>}, {transform_indices = @transform_4, window_bounds = array<i64: 3, 256>}, {transform_indices = @transform_5, window_bounds = array<i64: 1, 1, 256>}]} {
    %c0 = arith.constant 0 : index
    %c0_0 = arith.constant 0 : index
    %0 = vector.load %arg2[%c0, %c0_0] : memref<3x6xbf16, #tpu.memory_space<vmem>>, vector<3x6xbf16>
    %c0_1 = arith.constant 0 : index
    %c0_2 = arith.constant 0 : index
    %1 = vector.load %arg1[%c0_1, %c0_2] : memref<6x256xbf16, #tpu.memory_space<vmem>>, vector<6x256xbf16>
    %cst = arith.constant dense<0.000000e+00> : vector<3x256xf32>
    %2 = tpu.matmul %0, %1, %cst {dimension_numbers = #tpu.dot_dimension_numbers<[1], [0], [0], [1], [0, 0, 1, 1], [], []>} : vector<3x6xbf16>, vector<6x256xbf16>, vector<3x256xf32> -> vector<3x256xf32>
    %c0_3 = arith.constant 0 : index
    %c0_4 = arith.constant 0 : index
    %3 = vector.load %arg3[%c0_3, %c0_4] : memref<3x256xf32, #tpu.memory_space<vmem>>, vector<3x256xf32>
    %4 = arith.addf %2, %3 : vector<3x256xf32>
    %c0_5 = arith.constant 0 : index
    %c0_6 = arith.constant 0 : index
    %5 = vector.load %arg5[%c0_5, %c0_6] : memref<3x256xf32, #tpu.memory_space<vmem>>, vector<3x256xf32>
    tpu.vector_store %arg5[%c0_5, %c0_6], %4 {strides = array<i32>} : memref<3x256xf32, #tpu.memory_space<vmem>>, vector<3x256xf32>,
    %c0_7 = arith.constant 0 : index
    %c0_8 = arith.constant 0 : index
    %6 = vector.load %arg4[%c0_7, %c0_8] : memref<3x256xbf16, #tpu.memory_space<vmem>>, vector<3x256xbf16>
    %7 = arith.extf %6 : vector<3x256xbf16> to vector<3x256xf32>
    %8 = arith.subf %4, %7 : vector<3x256xf32>
    %9 = arith.mulf %8, %8 : vector<3x256xf32>
    %cst_9 = arith.constant dense<0.000000e+00> : vector<256xf32>
    %10 = vector.multi_reduction <add>, %9, %cst_9 [0] : vector<3x256xf32> to vector<256xf32>
    %11 = vector.shape_cast %10 : vector<256xf32> to vector<1x256xf32>
    %c0_10 = arith.constant 0 : index
    %c0_11 = arith.constant 0 : index
    %c0_12 = arith.constant 0 : index
    %12 = vector.load %arg6[%c0_10, %c0_11, %c0_12] : memref<1x1x256xf32, #tpu.memory_space<vmem>>, vector<1x1x256xf32>
    %13 = vector.shape_cast %12 : vector<1x1x256xf32> to vector<1x256xf32>
    %14 = vector.shape_cast %11 : vector<1x256xf32> to vector<1x1x256xf32>
    tpu.vector_store %arg6[%c0_10, %c0_11, %c0_12], %14 {strides = array<i32>} : memref<1x1x256xf32, #tpu.memory_space<vmem>>, vector<1x1x256xf32>,
    return
  }
  func.func @transform_0(%arg0: i32) -> (i32, i32) {
    %c0_i32 = arith.constant 0 : i32
    %c0_i32_0 = arith.constant 0 : i32
    return %c0_i32, %arg0 : i32, i32
  }
  func.func @transform_1(%arg0: i32) -> (i32, i32) {
    %c0_i32 = arith.constant 0 : i32
    %c0_i32_0 = arith.constant 0 : i32
    %c0_i32_1 = arith.constant 0 : i32
    return %c0_i32, %c0_i32_0 : i32, i32
  }
  func.func @transform_2(%arg0: i32) -> (i32, i32) {
    %c0_i32 = arith.constant 0 : i32
    %c0_i32_0 = arith.constant 0 : i32
    return %c0_i32, %arg0 : i32, i32
  }
  func.func @transform_3(%arg0: i32) -> (i32, i32) {
    %c0_i32 = arith.constant 0 : i32
    %c0_i32_0 = arith.constant 0 : i32
    return %c0_i32, %arg0 : i32, i32
  }
  func.func @transform_4(%arg0: i32) -> (i32, i32) {
    %c0_i32 = arith.constant 0 : i32
    %c0_i32_0 = arith.constant 0 : i32
    return %c0_i32, %arg0 : i32, i32
  }
  func.func @transform_5(%arg0: i32) -> (i32, i32, i32) {
    %c0_i32 = arith.constant 0 : i32
    %c0_i32_0 = arith.constant 0 : i32
    %c0_i32_1 = arith.constant 0 : i32
    return %arg0, %c0_i32, %c0_i32_0 : i32, i32, i32
  }
}

</mosaic_0001>

<bundles_post_ra>
// kernel: _forward.3
= control target key start
LH: loop header
LB: loop body
LE: loop exit
PB: predicated region body
PF: predicated region fallthrough
CT: control target
= control target key end

     0   :  { %s582_s18 = smov 0   ;;  %s625_s0 = inlined_call_operand.vmem [shape: bf16[6,512], index: 0, kind: input, shape index: {}]   ;;  %s626_s1 = inlined_call_operand.vmem [shape: bf16[3,6], index: 1, kind: input, shape index: {}]   ;;  %s627_s2 = inlined_call_operand.vmem [shape: f32[3,512], index: 2, kind: input, shape index: {}]   ;;  %s628_s3 = inlined_call_operand.vmem [shape: bf16[3,512], index: 3, kind: input, shape index: {}]   ;;  %s629_s4 = inlined_call_operand.vmem [shape: f32[3,512], index: 4, kind: output, shape index: {0}]   ;;  %s630_s5 = inlined_call_operand.vmem [shape: f32[2,1,256], index: 5, kind: output, shape index: {1}]  }
   0x1 LB: > { %s588_s19 = sadd.s32 4294967295, %s548_s18   ;;  %p513_p0 = scmp.ge.s32.totalorder %s548_s18, 1  ;;  %s548_s18 = sphi %s582_s18, %s16_s18  }
   0x2   : > { %p213_p1 = scmp.lt.s32.totalorder %s548_s18, 3 }
   0x4   : > { %p214_p2 = pnand %p513_p0, %p213_p1 }
   0x5   : > { %s514_s20 = sshll.u32 (!%p214_p2), %s588_s19, 1  ;;  %v550_v0 = vmov (!%p214_p2), 0   ;;  %vm299_vm0 = vcmask (!%p214_p2), 1042432   ;;  %v284_v5 = vld [vmem:[%s626_s1] sm:$0x3] (!%p214_p2)  ;;  %vm295_vm1 = vcmask (!%p214_p2), 48128   ;;  %v381_v30 = vlaneseq (!%p214_p2) }
   0x6   : > { %217 = sbr.rel (%p214_p2) target bundleno = 262 (0x106), region = 36  ;;  %p256_p3 = scmp.lt.s32.totalorder (!%p214_p2), %s514_s20, 3  ;;  %338 = vmatprep.mubr.bf16.mxu0 (!%p214_p2), %v550_v0  ;;  %v551_v28 = vmov (!%p214_p2), 1966171168  }
   0x7   : > { %v379_v29 = vunpack.c.l.s4 (!%p214_p2), %v551_v28  ;;  %p279_p4 = scmp.lt.s32.totalorder (!%p214_p2), %s588_s19, 1  ;;  %v382_v36 = vshrl.u32 (!%p214_p2), %v381_v30, 7  ;;  %vm395_vm2 = vcmp.lt.s32.totalorder (!%p214_p2), %v381_v30, 256 }
   0x9   : > { %v380_v35 = vunpack.c.0.s8 (!%p214_p2), %v379_v29 }
   0xb   : > { %v383_v41 = vsub.s32 (!%p214_p2), %v380_v35, %v382_v36 }
   0xd   : > { %s632_s20 = smov (!%p256_p3, %s514_s20), 3  ;;  %s634_s19 = smov (!%p279_p4, %s588_s19), 1 }
   0xe   : > { %s593_s21 = sshll.u32 %s632_s20, 2  ;;  %s519_s27 = sshll.u32 %s632_s20, 1 }
   0xf   : > { %s259_s24 = scalar_lea.vmem %s625_s0, %s593_s21  ;;  %s271_s30 = scalar_lea.vmem %s628_s3, %s519_s27 }
  0x10   : > { %v285_v1 = vld [vmem:[%s259_s24] sm:$0x77]  ;;  %s265_s8 = scalar_lea.vmem %s627_s2, %s593_s21  ;;  %s277_s11 = scalar_lea.vmem %s629_s4, %s593_s21 }
  0x11   : > { %v524_v2 = vcombine.high %v285_v1, %v285_v1  ;;  %v523_v3 = vcombine.low %v285_v1, %v285_v1  ;;  %v352_v6 = vld [vmem:[%s271_s30] sm:$0xf]  ;;  %s522_s12 = sshll.u32 %s634_s19, 1 }
  0x12   : > { %v286_v7 = vld [vmem:[%s265_s8] sm:$0x77]  ;;  %v353_v8 = vunpack.c.l.bf16 %v352_v6  ;;  %s282_s15 = scalar_lea.vmem %s630_s5, %s522_s12 }
  0x13   : > { %525 = vmatprep.subr.msk.bf16.mxu0 %vm299_vm0, %v524_v2  ;;  %v301_v4 = vsel %vm299_vm0, %v523_v3, 0  ;;  %v293_v9 = vcombine.high %v286_v7, %v286_v7 }
  0x14   : > { %307 = vmatpush1.bf16.msra.mxu0 %v301_v4  ;;  %v355_v11 = vcombine.high %v353_v8, %v353_v8 }
  0x17   : > { %526 = vmatmul.mubr.msk.bf16.vlgmr.msra.gmra.mrb[0].mxu0 %vm295_vm1, %v284_v5 }
  0xea   : > { %v340_v10 = vpop.f32.mrb[0].mxu0 }
  0xeb   : > { %v341_v12 = vadd.f32 %v340_v10, %v286_v7  ;;  %v342_v13 = vpop.f32.mrb[1].mxu0 }
  0xec   : > { %v343_v14 = vadd.f32 %v342_v13, %v293_v9  ;;  %v344_v15 = vpop.f32.mrb[2].mxu0 }
  0xed   : > { %v357_v16 = vsub.f32 %v341_v12, %v353_v8  ;;  %v345_v17 = vpop.f32.mrb[3].mxu0 }
  0xee   : > { %v349_v18 = vcombine.low %v341_v12, %v343_v14  ;;  %v358_v19 = vsub.f32 %v343_v14, %v355_v11 }
  0xef   : > { %v359_v20 = vmul.f32 %v357_v16, %v357_v16 }
  0xf0   : > { %351 = vst [vmem:[%s277_s11] sm:$0x77] %v349_v18  ;;  %v360_v21 = vmul.f32 %v358_v19, %v358_v19 }
  0xf1   : > { %v361_v22 = vsel %vm299_vm0, %v359_v20, 0.0 }
  0xf2   : > { %v362_v23 = vrot.slane %v361_v22, 4  ;;  %v368_v24 = vsel %vm299_vm0, %v360_v21, 0.0 }
  0xf3   : > { %v369_v25 = vrot.slane %v368_v24, 4 }
  0xf4   : > { %v363_v26 = vadd.f32 %v362_v23, %v361_v22 }
  0xf5   : > { %v370_v27 = vadd.f32 %v369_v25, %v368_v24 }
  0xf6   : > { %v364_v31 = vrot.slane %v363_v26, 2 }
  0xf7   : > { %v371_v32 = vrot.slane %v370_v27, 2 }
  0xf8   : > { %v365_v33 = vadd.f32 %v364_v31, %v363_v26 }
  0xf9   : > { %v372_v34 = vadd.f32 %v371_v32, %v370_v27 }
  0xfa   : > { %v366_v37 = vrot.slane %v365_v33, 1 }
  0xfb   : > { %v373_v38 = vrot.slane %v372_v34, 1 }
  0xfc   : > { %v367_v39 = vadd.f32 %v366_v37, %v365_v33 }
  0xfd   : > { %v374_v40 = vadd.f32 %v373_v38, %v372_v34 }
  0xff   : > { %v377_v42 = vcombine.low %v367_v39, %v374_v40 }
 0x101   : > { %v384_v43 = vrot.slane %v377_v42, %v383_v41 }
 0x103   : > { %v391_v44 = vrot.slane %v384_v43, %v383_v41 }
 0x105   : > { %397 = vst.msk [vmem:[%s282_s15] sm:$0x3] %vm395_vm2, %v391_v44 }
 0x106 PF: > { %s16_s18 = sadd.s32 1, %s548_s18  }
 0x107   : > { %p13_p5 = scmp.ge.s32.totalorder %s16_s18, 4  }
 0x109   :  { %15 = sbr.rel (!%p13_p5) target bundleno = 1 (0x1), region = 84 }

// kernel: _forward.2
= control target key start
LH: loop header
LB: loop body
LE: loop exit
PB: predicated region body
PF: predicated region fallthrough
CT: control target
= control target key end

     0   :  { %s667_s18 = smov 0   ;;  %s669_s19 = smov 0   ;;  %s724_s0 = inlined_call_operand.vmem [shape: bf16[10,512], index: 0, kind: input, shape index: {}]   ;;  %s725_s1 = inlined_call_operand.vmem [shape: bf16[3,10], index: 1, kind: input, shape index: {}]   ;;  %s726_s2 = inlined_call_operand.vmem [shape: f32[3,512], index: 2, kind: input, shape index: {}]   ;;  %s727_s3 = inlined_call_operand.vmem [shape: bf16[3,512], index: 3, kind: input, shape index: {}]   ;;  %s728_s4 = inlined_call_operand.vmem [shape: f32[3,512], index: 4, kind: output, shape index: {0}]   ;;  %s729_s5 = inlined_call_operand.vmem [shape: f32[2,1,256], index: 5, kind: output, shape index: {1}]  }
   0x1   :  { %s671_s20 = smov 0  }
   0x2 LB: > { %s680_s21 = sadd.s32 4294967295, %s633_s20   ;;  %s682_s22 = sadd.s32 1, %s633_s20   ;;  %s633_s20 = sphi %s671_s20, %s732_s20   ;;  %s629_s19 = sphi %s669_s19, %s731_s19   ;;  %s625_s18 = sphi %s667_s18, %s730_s18  }
   0x3   : > { %s20_s23 = ssub.s32 %s633_s20, %s682_s22  ;;  %s23_s24 = sadd.s32 1, %s629_s19 }
   0x4   : > { %p21_p0 = scmp.eq.s32.totalorder %s20_s23, 0  ;;  %p30_p1 = scmp.ne.s32.totalorder %s629_s19, %s625_s18 }
   0x5   : > { %p31_p2 = scmp.eq.s32.totalorder %s633_s20, 0  ;;  %p561_p4 = scmp.ge.s32.totalorder %s633_s20, 2 }
   0x6   : > { %s689_s25 = scalar_select %p21_p0, %s629_s19, %s23_s24  }
   0x7   : > { %p32_p3 = por %p31_p2, %p30_p1  ;;  %184 = sbr.rel (%p561_p4) target bundleno = 21 (0x15), region = 20 }
   0xe   : > { %187 = sbr.rel (!%p32_p3) target bundleno = 21 (0x15), region = 24  ;;  %s189_s26 = sand.u32 (%p32_p3), 1, %s629_s19  }
   0xf   : > { %s580_s27 = sshll.u32 (%p32_p3), %s633_s20, 3  ;;  %s562_s28 = sshll.u32 (%p32_p3), %s189_s26, 4 }
  0x10   : > { %s194_s6 = scalar_lea.vmem (%p32_p3), %s724_s0, %s580_s27  ;;  %s191_s7 = scalar_lea.vmem (%p32_p3), [#allocation2], %s562_s28 }
  0x11   : > { %v224_v0 = vld [vmem:[%s194_s6] sm:$0xff] (%p32_p3)  ;;  %v226_v1 = vld [vmem:[%s194_s6 + $0x10] sm:$0xff] (%p32_p3) }
  0x12   : > { %225 = vst [vmem:[%s191_s7] sm:$0xff] (%p32_p3), %v224_v0  ;;  %227 = vst [vmem:[%s191_s7 + $0x8] sm:$0xff] (%p32_p3), %v226_v1 }
  0x15 PF: > { %p565_p5 = scmp.ge.s32.totalorder %s633_s20, 1  ;;  %p250_p6 = scmp.lt.s32.totalorder %s633_s20, 3 }
  0x17   : > { %p251_p7 = pnand %p565_p5, %p250_p6 }
  0x18   : > { %s257_s8 = sand.u32 (!%p251_p7), 1, %s625_s18   ;;  %v635_v2 = vmov (!%p251_p7), 0   ;;  %vm341_vm0 = vcmask (!%p251_p7), 1044480   ;;  %v322_v6 = vld [vmem:[%s725_s1] sm:$0x3] (!%p251_p7)  ;;  %vm337_vm1 = vcmask (!%p251_p7), 80896   ;;  %v424_v31 = vlaneseq (!%p251_p7) }
  0x19   : > { %254 = sbr.rel (%p251_p7) target bundleno = 271 (0x10f), region = 70  ;;  %s566_s9 = sshll.u32 (!%p251_p7), %s257_s8, 4  ;;  %380 = vmatprep.mubr.bf16.mxu0 (!%p251_p7), %v635_v2  ;;  %vm403_vm2 = vcmask (!%p251_p7), 1042432   ;;  %v636_v29 = vmov (!%p251_p7), 1966171168  }
  0x1a   : > { %s259_s10 = scalar_lea.vmem (!%p251_p7), [#allocation2], %s566_s9  ;;  %s567_s13 = sshll.u32 (!%p251_p7), %s680_s21, 1  ;;  %v422_v30 = vunpack.c.l.s4 (!%p251_p7), %v636_v29  ;;  %v425_v37 = vshrl.u32 (!%p251_p7), %v424_v31, 7  ;;  %vm438_vm3 = vcmp.lt.s32.totalorder (!%p251_p7), %v424_v31, 256 }
  0x1b   : > { %v607_v3 = vld [vmem:[%s259_s10 + $0x4] ss:$8 sps:$4 sm:$0x1f] (!%p251_p7)   ;;  %v609_v4 = vld [vmem:[%s259_s10] ss:$8 sps:$4 sm:$0x1f] (!%p251_p7)  }
  0x1c   : > { %576 = vmatprep.subr.msk.bf16.mxu0 (!%p251_p7), %vm341_vm0, %v607_v3  ;;  %v343_v5 = vsel (!%p251_p7), %vm341_vm0, %v609_v4, 0  ;;  %p300_p8 = scmp.lt.s32.totalorder (!%p251_p7), %s567_s13, 3  ;;  %p317_p9 = scmp.lt.s32.totalorder (!%p251_p7), %s680_s21, 1  ;;  %v423_v36 = vunpack.c.0.s8 (!%p251_p7), %v422_v30 }
  0x1d   : > { %349 = vmatpush1.bf16.msra.mxu0 (!%p251_p7), %v343_v5 }
  0x1e   : > { %v426_v42 = vsub.s32 (!%p251_p7), %v423_v36, %v425_v37 }
  0x20   : > { %577 = vmatmul.mubr.msk.bf16.vlgmr.msra.gmra.mrb[0].mxu0 %vm337_vm1, %v322_v6  ;;  %s734_s13 = smov (!%p300_p8, %s567_s13), 3  ;;  %s736_s21 = smov (!%p317_p9, %s680_s21), 1 }
  0x21   : > { %s570_s14 = sshll.u32 %s734_s13, 1  ;;  %s568_s15 = sshll.u32 %s734_s13, 2 }
  0x22   : > { %s309_s18 = scalar_lea.vmem %s727_s3, %s570_s14  ;;  %s303_s24 = scalar_lea.vmem %s726_s2, %s568_s15 }
  0x23   : > { %v394_v7 = vld [vmem:[%s309_s18] sm:$0xf]  ;;  %s315_s28 = scalar_lea.vmem %s728_s4, %s568_s15  ;;  %s573_s29 = sshll.u32 %s736_s21, 1 }
  0x24   : > { %v325_v8 = vld [vmem:[%s303_s24] sm:$0x77]  ;;  %v395_v9 = vunpack.c.l.bf16 %v394_v7  ;;  %s320_s7 = scalar_lea.vmem %s729_s5, %s573_s29 }
  0x25   : > { %v335_v10 = vcombine.high %v325_v8, %v325_v8 }
  0x26   : > { %v397_v12 = vcombine.high %v395_v9, %v395_v9 }
  0xf3   : > { %v382_v11 = vpop.f32.mrb[0].mxu0 }
  0xf4   : > { %v383_v13 = vadd.f32 %v382_v11, %v325_v8  ;;  %v384_v14 = vpop.f32.mrb[1].mxu0 }
  0xf5   : > { %v385_v15 = vadd.f32 %v384_v14, %v335_v10  ;;  %v386_v16 = vpop.f32.mrb[2].mxu0 }
  0xf6   : > { %v399_v17 = vsub.f32 %v383_v13, %v395_v9  ;;  %v387_v18 = vpop.f32.mrb[3].mxu0 }
  0xf7   : > { %v391_v19 = vcombine.low %v383_v13, %v385_v15  ;;  %v400_v20 = vsub.f32 %v385_v15, %v397_v12 }
  0xf8   : > { %v401_v21 = vmul.f32 %v399_v17, %v399_v17 }
  0xf9   : > { %393 = vst [vmem:[%s315_s28] sm:$0x77] %v391_v19  ;;  %v402_v22 = vmul.f32 %v400_v20, %v400_v20 }
  0xfa   : > { %v404_v23 = vsel %vm403_vm2, %v401_v21, 0.0 }
  0xfb   : > { %v405_v24 = vrot.slane %v404_v23, 4  ;;  %v411_v25 = vsel %vm403_vm2, %v402_v22, 0.0 }
  0xfc   : > { %v412_v26 = vrot.slane %v411_v25, 4 }
  0xfd   : > { %v406_v27 = vadd.f32 %v405_v24, %v404_v23 }
  0xfe   : > { %v413_v28 = vadd.f32 %v412_v26, %v411_v25 }
  0xff   : > { %v407_v32 = vrot.slane %v406_v27, 2 }
 0x100   : > { %v414_v33 = vrot.slane %v413_v28, 2 }
 0x101   : > { %v408_v34 = vadd.f32 %v407_v32, %v406_v27 }
 0x102   : > { %v415_v35 = vadd.f32 %v414_v33, %v413_v28 }
 0x103   : > { %v409_v38 = vrot.slane %v408_v34, 1 }
 0x104   : > { %v416_v39 = vrot.slane %v415_v35, 1 }
 0x105   : > { %v410_v40 = vadd.f32 %v409_v38, %v408_v34 }
 0x106   : > { %v417_v41 = vadd.f32 %v416_v39, %v415_v35 }
 0x108   : > { %v420_v43 = vcombine.low %v410_v40, %v417_v41 }
 0x10a   : > { %v427_v44 = vrot.slane %v420_v43, %v426_v42 }
 0x10c   : > { %v434_v45 = vrot.slane %v427_v44, %v426_v42 }
 0x10e   : > { %440 = vst.msk [vmem:[%s320_s7] sm:$0x3] %vm438_vm3, %v434_v45 }
 0x10f PF: > { %p13_p10 = scmp.ge.s32.totalorder %s682_s22, 4   ;;  %s730_s18 = smov %s629_s19 }
 0x110   : > { %s731_s19 = smov %s689_s25  ;;  %s732_s20 = smov %s682_s22 }
 0x111   :  { %15 = sbr.rel (!%p13_p10) target bundleno = 2 (0x2), region = 127 }

</bundles_post_ra>
